<compile_context>
chip_gen: v6e
topology: v6e:2x2x1
jax: 0.10.0
libtpu: 0.0.40
codegen_flags: <defaults>
</compile_context>

<pallas_src>
import jax
import jax.numpy as jnp
from jax import lax
from jax.experimental import pallas as pl
from jax.experimental.pallas import tpu as pltpu


def _round_up(n, m):
    return ((n + m - 1) // m) * m


def mlp_kernel(x_ref, ids_ref, w1x_ref, tab_ref, w2_ref, b2_ref, o_ref):
    # x_ref:   [TB, Din]  bf16        ids_ref: [TB, 2] int32 (model_id, strategy_id)
    # w1x_ref: [Din, Hp]  bf16        tab_ref: [2*NR, Hp] bf16 (b1 folded into rows 0..NR)
    # w2_ref:  [1, Hp]    bf16        b2_ref:  [1, 1] f32
    # o_ref:   [1, TB]    f32
    tb = x_ref.shape[0]
    ntab = tab_ref.shape[0]
    nr = ntab // 2  # model rows in [0, nr), strategy rows in [nr, ntab)

    ids = ids_ref[...]
    mid = ids[:, 0:1]
    sid = ids[:, 1:2] + nr
    lane = lax.broadcasted_iota(jnp.int32, (tb, ntab), 1)
    # Two-hot row: one 1 in the model section, one 1 in the strategy section.
    # (Out-of-range ids silently contribute a zero row — checked in the wrapper.)
    two_hot = jnp.logical_or(lane == mid, lane == sid).astype(jnp.bfloat16)

    # Layer 1 on the MXU, f32 accumulation.  Padded hidden lanes stay exactly 0.
    h = jnp.dot(x_ref[...].astype(jnp.bfloat16), w1x_ref[...],
                preferred_element_type=jnp.float32)
    h = h + jnp.dot(two_hot, tab_ref[...], preferred_element_type=jnp.float32)
    h = jnp.maximum(h, 0.0)  # b1 already folded into the model table rows

    # Layer 2 transposed: batch on the lane axis -> lane-dense [1, TB] output.
    out = jnp.einsum("oh,bh->ob", w2_ref[...], h.astype(jnp.bfloat16),
                     preferred_element_type=jnp.float32)
    out = out + b2_ref[...]

    # Numerically stable softplus in f32 (only TB elements, not TB x 128).
    out = jnp.maximum(out, 0.0) + jnp.log1p(jnp.exp(-jnp.abs(out)))
    o_ref[...] = out.astype(o_ref.dtype)


def mlp_regressor_forward(x, model_ids, strategy_ids, fparams, block_batch=1024):
    """Forward pass of MLPRegressor using the folded / padded params."""
    b, din = x.shape
    hp = fparams["w1x"].shape[1]
    ntab = fparams["tab"].shape[0]

    # Batch tile: single full-array tile for small B; 128-aligned tiles otherwise
    # (the [1, TB] output block needs a 128-multiple lane dim once grid > 1).
    if b <= block_batch:
        tb = max(_round_up(b, 8), 8)
    else:
        tb = _round_up(block_batch, 128)
    bp = _round_up(b, tb)

    pad = bp - b
    if pad:
        x = jnp.pad(x, ((0, pad), (0, 0)))
        model_ids = jnp.pad(model_ids, (0, pad))
        strategy_ids = jnp.pad(strategy_ids, (0, pad))

    x = x.astype(jnp.bfloat16)  # halve input DMA bytes; MXU operand dtype
    ids = jnp.stack([model_ids.astype(jnp.int32),
                     strategy_ids.astype(jnp.int32)], axis=-1)  # [bp, 2]

    grid = (bp // tb,)
    out = pl.pallas_call(
        mlp_kernel,
        out_shape=jax.ShapeDtypeStruct((1, bp), jnp.float32),
        grid_spec=pltpu.PrefetchScalarGridSpec(
            num_scalar_prefetch=0,
            grid=grid,
            in_specs=[
                pl.BlockSpec((tb, din), lambda i: (i, 0)),    # x (batch-tiled)
                pl.BlockSpec((tb, 2), lambda i: (i, 0)),      # ids (batch-tiled)
                pl.BlockSpec((din, hp), lambda i: (0, 0)),    # w1x (VMEM-resident)
                pl.BlockSpec((ntab, hp), lambda i: (0, 0)),   # folded emb table
                pl.BlockSpec((1, hp), lambda i: (0, 0)),      # w2 row
                pl.BlockSpec((1, 1), lambda i: (0, 0)),       # b2 scalar
            ],
            out_specs=pl.BlockSpec((1, tb), lambda i: (0, i)),
        ),
        compiler_params=pltpu.CompilerParams(
            dimension_semantics=("parallel",),  # v7x: shard batch tiles over both TCs
        ),
    )(x, ids, fparams["w1x"], fparams["tab"], fparams["w2"], fparams["b2"])
    return out[0, :b]


def fold_and_pad_params(params, input_dim, emb_dim, sublane=8, lane=128):
    """Split w1, fold embeddings (and b1) into one H-wide table, pad, cast to bf16."""
    w1, b1, w2, b2 = params["w1"], params["b1"], params["w2"], params["b2"]
    hidden = w1.shape[1]
    hp = _round_up(hidden, lane)

    w1_x = w1[:input_dim]                              # [Din, H]
    w1_m = w1[input_dim:input_dim + emb_dim]           # [E, H]
    w1_s = w1[input_dim + emb_dim:]                    # [E, H]

    # Fold in f32; b1 goes into the model rows (each two-hot picks exactly one).
    mtab = params["model_emb"] @ w1_m + b1[None, :]    # [num_models, H]
    stab = params["strategy_emb"] @ w1_s               # [num_strategies, H]

    # Pad both sections to the same row count so the kernel can derive the
    # strategy offset statically as tab.shape[0] // 2.
    nrow = _round_up(max(mtab.shape[0], stab.shape[0]), sublane)

    def pad_to(a, shape):
        return jnp.pad(a, [(0, t - s) for s, t in zip(a.shape, shape)])

    tab = jnp.concatenate([pad_to(mtab, (nrow, hidden)),
                           pad_to(stab, (nrow, hidden))], axis=0)   # [2*NR, H]

    return {
        "w1x": pad_to(w1_x, (input_dim, hp)).astype(jnp.bfloat16),
        "tab": pad_to(tab, (2 * nrow, hp)).astype(jnp.bfloat16),
        "w2": pad_to(w2.T, (1, hp)).astype(jnp.bfloat16),    # [1, Hp] row
        "b2": b2.reshape(1, 1).astype(jnp.float32),
    }


def init_params(key, input_dim, num_models, num_strategies,
                emb_dim=64, hidden_dim=100):
    """Deterministic parameter init mirroring the PyTorch module's shapes."""
    keys = jax.random.split(key, 6)
    in_feat = input_dim + 2 * emb_dim
    model_emb = jax.random.normal(keys[0], (num_models, emb_dim), jnp.float32)
    strategy_emb = jax.random.normal(keys[1], (num_strategies, emb_dim), jnp.float32)
    lim1 = 1.0 / float(jnp.sqrt(in_feat))
    w1 = jax.random.uniform(keys[2], (in_feat, hidden_dim), jnp.float32, -lim1, lim1)
    b1 = jax.random.uniform(keys[3], (hidden_dim,), jnp.float32, -lim1, lim1)
    lim2 = 1.0 / float(jnp.sqrt(hidden_dim))
    w2 = jax.random.uniform(keys[4], (hidden_dim, 1), jnp.float32, -lim2, lim2)
    b2 = jax.random.uniform(keys[5], (1,), jnp.float32, -lim2, lim2)
    return {
        "model_emb": model_emb,
        "strategy_emb": strategy_emb,
        "w1": w1, "b1": b1,
        "w2": w2, "b2": b2,
    }


if __name__ == "__main__":
    # Small, module-consistent shapes.
    batch = 8
    input_dim = 16
    num_models = 5
    num_strategies = 3
    emb_dim = 64
    hidden_dim = 100

    key = jax.random.PRNGKey(0)
    k_param, k_x, k_m, k_s = jax.random.split(key, 4)

    params = init_params(k_param, input_dim, num_models, num_strategies,
                         emb_dim=emb_dim, hidden_dim=hidden_dim)
    fparams = fold_and_pad_params(params, input_dim, emb_dim)

    x = jax.random.normal(k_x, (batch, input_dim), jnp.float32)
    model_ids = jax.random.randint(k_m, (batch,), 0, num_models, jnp.int32)
    strategy_ids = jax.random.randint(k_s, (batch,), 0, num_strategies, jnp.int32)

    # Wrapper-side sanity: out-of-range ids would silently map to a zero row.
    assert int(jnp.max(model_ids)) < num_models
    assert int(jnp.max(strategy_ids)) < num_strategies

    # jit so the pad / id-stack / final-row slice fuse with the pallas_call.
    fwd = jax.jit(mlp_regressor_forward)
    out = jax.block_until_ready(fwd(x, model_ids, strategy_ids, fparams))

    # Reference check against plain JAX (original f32, unfolded formulation).
    model_emb = jnp.take(params["model_emb"], model_ids, axis=0)
    strategy_emb = jnp.take(params["strategy_emb"], strategy_ids, axis=0)
    x_cat = jnp.concatenate([x, model_emb, strategy_emb], axis=-1)
    h_ref = jnp.maximum(x_cat @ params["w1"] + params["b1"], 0.0)
    logits = h_ref @ params["w2"] + params["b2"]
    ref = jax.nn.softplus(logits)[:, 0]

    assert out.shape == (batch,)
    # Tolerance loosened vs. the pure-f32 version because the MXU operands are bf16.
    assert jnp.allclose(out, ref, atol=2e-2, rtol=2e-2)

    print("KERNEL_OK")
</pallas_src>

<mosaic_0001>
module attributes {stable_mosaic.version = 11 : i64} {
  func.func @mlp_kernel(%arg0: i32, %arg1: memref<8x16xbf16, #tpu.memory_space<vmem>>, %arg2: memref<8x2xi32, #tpu.memory_space<vmem>>, %arg3: memref<16x128xbf16, #tpu.memory_space<vmem>>, %arg4: memref<16x128xbf16, #tpu.memory_space<vmem>>, %arg5: memref<1x128xbf16, #tpu.memory_space<vmem>>, %arg6: memref<1x1xf32, #tpu.memory_space<vmem>>, %arg7: memref<1x8xf32, #tpu.memory_space<vmem>>) attributes {dimension_semantics = [#tpu.dimension_semantics<parallel>], iteration_bounds = array<i64: 1>, scalar_prefetch = 0 : i64, scratch_operands = 0 : i64, tpu.core_type = #tpu.core_type<tc>, window_params = [{transform_indices = @transform_0, window_bounds = array<i64: 8, 16>}, {transform_indices = @transform_1, window_bounds = array<i64: 8, 2>}, {pipeline_mode = #tpu.pipeline_mode<synchronous>, transform_indices = @transform_2, window_bounds = array<i64: 16, 128>}, {pipeline_mode = #tpu.pipeline_mode<synchronous>, transform_indices = @transform_3, window_bounds = array<i64: 16, 128>}, {pipeline_mode = #tpu.pipeline_mode<synchronous>, transform_indices = @transform_4, window_bounds = array<i64: 1, 128>}, {pipeline_mode = #tpu.pipeline_mode<synchronous>, transform_indices = @transform_5, window_bounds = array<i64: 1, 1>}, {transform_indices = @transform_6, window_bounds = array<i64: 1, 8>}]} {
    %c0 = arith.constant 0 : index
    %c0_0 = arith.constant 0 : index
    %0 = vector.load %arg2[%c0, %c0_0] : memref<8x2xi32, #tpu.memory_space<vmem>>, vector<8x2xi32>
    %1 = vector.extract_strided_slice %0 {offsets = [0, 0], sizes = [8, 1], strides = [1, 1]} : vector<8x2xi32> to vector<8x1xi32>
    %2 = vector.extract_strided_slice %0 {offsets = [0, 1], sizes = [8, 1], strides = [1, 1]} : vector<8x2xi32> to vector<8x1xi32>
    %c8_i32 = arith.constant 8 : i32
    %3 = vector.broadcast %c8_i32 : i32 to vector<8x1xi32>
    %4 = arith.addi %2, %3 : vector<8x1xi32>
    %5 = tpu.iota {dimensions = array<i32: 1>} : vector<8x16xi32>
    %6 = vector.broadcast %1 : vector<8x1xi32> to vector<8x16xi32>
    %7 = arith.cmpi eq, %5, %6 : vector<8x16xi32>
    %8 = vector.broadcast %4 : vector<8x1xi32> to vector<8x16xi32>
    %9 = arith.cmpi eq, %5, %8 : vector<8x16xi32>
    %10 = arith.ori %7, %9 : vector<8x16xi1>
    %11 = arith.extui %10 : vector<8x16xi1> to vector<8x16xi32>
    %12 = arith.sitofp %11 : vector<8x16xi32> to vector<8x16xf32>
    %13 = arith.truncf %12 : vector<8x16xf32> to vector<8x16xbf16>
    %c0_1 = arith.constant 0 : index
    %c0_2 = arith.constant 0 : index
    %14 = vector.load %arg1[%c0_1, %c0_2] : memref<8x16xbf16, #tpu.memory_space<vmem>>, vector<8x16xbf16>
    %c0_3 = arith.constant 0 : index
    %c0_4 = arith.constant 0 : index
    %15 = vector.load %arg3[%c0_3, %c0_4] : memref<16x128xbf16, #tpu.memory_space<vmem>>, vector<16x128xbf16>
    %cst = arith.constant dense<0.000000e+00> : vector<8x128xf32>
    %16 = tpu.matmul %14, %15, %cst {dimension_numbers = #tpu.dot_dimension_numbers<[1], [0], [0], [1], [0, 0, 1, 1], [], []>} : vector<8x16xbf16>, vector<16x128xbf16>, vector<8x128xf32> -> vector<8x128xf32>
    %c0_5 = arith.constant 0 : index
    %c0_6 = arith.constant 0 : index
    %17 = vector.load %arg4[%c0_5, %c0_6] : memref<16x128xbf16, #tpu.memory_space<vmem>>, vector<16x128xbf16>
    %cst_7 = arith.constant dense<0.000000e+00> : vector<8x128xf32>
    %18 = tpu.matmul %13, %17, %cst_7 {dimension_numbers = #tpu.dot_dimension_numbers<[1], [0], [0], [1], [0, 0, 1, 1], [], []>} : vector<8x16xbf16>, vector<16x128xbf16>, vector<8x128xf32> -> vector<8x128xf32>
    %19 = arith.addf %16, %18 : vector<8x128xf32>
    %cst_8 = arith.constant 0.000000e+00 : f32
    %20 = vector.broadcast %cst_8 : f32 to vector<8x128xf32>
    %21 = arith.maximumf %19, %20 : vector<8x128xf32>
    %c0_9 = arith.constant 0 : index
    %c0_10 = arith.constant 0 : index
    %22 = vector.load %arg5[%c0_9, %c0_10] : memref<1x128xbf16, #tpu.memory_space<vmem>>, vector<1x128xbf16>
    %23 = arith.truncf %21 : vector<8x128xf32> to vector<8x128xbf16>
    "tpu.trace_start"() <{level = 10 : i32, message = "oh,bh->ob"}> : () -> ()
    %cst_11 = arith.constant dense<0.000000e+00> : vector<1x8xf32>
    %24 = tpu.matmul %22, %23, %cst_11 {dimension_numbers = #tpu.dot_dimension_numbers<[1], [1], [0], [0], [0, 0, 1, 0], [], []>} : vector<1x128xbf16>, vector<8x128xbf16>, vector<1x8xf32> -> vector<1x8xf32>
    "tpu.trace_stop"() : () -> ()
    %c0_12 = arith.constant 0 : index
    %c0_13 = arith.constant 0 : index
    %25 = vector.load %arg6[%c0_12, %c0_13] : memref<1x1xf32, #tpu.memory_space<vmem>>, vector<1x1xf32>
    %26 = vector.broadcast %25 : vector<1x1xf32> to vector<1x8xf32>
    %27 = arith.addf %24, %26 : vector<1x8xf32>
    %cst_14 = arith.constant 0.000000e+00 : f32
    %28 = vector.broadcast %cst_14 : f32 to vector<1x8xf32>
    %29 = arith.maximumf %27, %28 : vector<1x8xf32>
    %30 = math.absf %27 : vector<1x8xf32>
    %cst_15 = arith.constant 0.000000e+00 : f32
    %31 = vector.broadcast %cst_15 : f32 to vector<1x8xf32>
    %32 = arith.subf %31, %30 : vector<1x8xf32>
    %33 = math.exp %32 : vector<1x8xf32>
    %34 = math.log1p %33 : vector<1x8xf32>
    %35 = arith.addf %29, %34 : vector<1x8xf32>
    %c0_16 = arith.constant 0 : index
    %c0_17 = arith.constant 0 : index
    %36 = vector.load %arg7[%c0_16, %c0_17] : memref<1x8xf32, #tpu.memory_space<vmem>>, vector<1x8xf32>
    tpu.vector_store %arg7[%c0_16, %c0_17], %35 {strides = array<i32>} : memref<1x8xf32, #tpu.memory_space<vmem>>, vector<1x8xf32>,
    return
  }
  func.func @transform_0(%arg0: i32) -> (i32, i32) {
    %c0_i32 = arith.constant 0 : i32
    %c0_i32_0 = arith.constant 0 : i32
    return %arg0, %c0_i32 : i32, i32
  }
  func.func @transform_1(%arg0: i32) -> (i32, i32) {
    %c0_i32 = arith.constant 0 : i32
    %c0_i32_0 = arith.constant 0 : i32
    return %arg0, %c0_i32 : i32, i32
  }
  func.func @transform_2(%arg0: i32) -> (i32, i32) {
    %c0_i32 = arith.constant 0 : i32
    %c0_i32_0 = arith.constant 0 : i32
    %c0_i32_1 = arith.constant 0 : i32
    return %c0_i32, %c0_i32_0 : i32, i32
  }
  func.func @transform_3(%arg0: i32) -> (i32, i32) {
    %c0_i32 = arith.constant 0 : i32
    %c0_i32_0 = arith.constant 0 : i32
    %c0_i32_1 = arith.constant 0 : i32
    return %c0_i32, %c0_i32_0 : i32, i32
  }
  func.func @transform_4(%arg0: i32) -> (i32, i32) {
    %c0_i32 = arith.constant 0 : i32
    %c0_i32_0 = arith.constant 0 : i32
    %c0_i32_1 = arith.constant 0 : i32
    return %c0_i32, %c0_i32_0 : i32, i32
  }
  func.func @transform_5(%arg0: i32) -> (i32, i32) {
    %c0_i32 = arith.constant 0 : i32
    %c0_i32_0 = arith.constant 0 : i32
    %c0_i32_1 = arith.constant 0 : i32
    return %c0_i32, %c0_i32_0 : i32, i32
  }
  func.func @transform_6(%arg0: i32) -> (i32, i32) {
    %c0_i32 = arith.constant 0 : i32
    %c0_i32_0 = arith.constant 0 : i32
    return %c0_i32, %arg0 : i32, i32
  }
}

</mosaic_0001>

<bundles_post_ra>
// kernel: mlp_regressor_forward.1
= control target key start
LH: loop header
LB: loop body
LE: loop exit
PB: predicated region body
PF: predicated region fallthrough
CT: control target
= control target key end

     0   :  { %s363_s0 = inlined_call_operand.vmem [shape: bf16[8,16], index: 0, kind: input, shape index: {}]   ;;  %s364_s1 = inlined_call_operand.vmem [shape: s32[8,2], index: 1, kind: input, shape index: {}]   ;;  %s365_s2 = inlined_call_operand.vmem [shape: bf16[16,128], index: 2, kind: input, shape index: {}]   ;;  %s366_s3 = inlined_call_operand.vmem [shape: bf16[16,128], index: 3, kind: input, shape index: {}]   ;;  %s367_s4 = inlined_call_operand.vmem [shape: bf16[1,128], index: 4, kind: input, shape index: {}]   ;;  %s368_s5 = inlined_call_operand.<no memory space> [shape: f32[1,1], index: 5, kind: input, shape index: {}]   ;;  %s369_s6 = inlined_call_operand.hbm [shape: f32[1,8], index: 6, kind: output, shape index: {}]  }
   0x1   :  { %v11_v0 = vstv %s368_s5 }
   0x2   :  { %12 = vst [vmem:[#allocation2] sm:$0x1] %v11_v0 }
   0x3   :  { %v27_v1 = vld [vmem:[%s364_s1] sm:$0xff]  ;;  %v297_v2 = vmov 0   ;;  %v298_v3 = vmov 0.0   ;;  %vm299_vm0 = vmmov 0   ;;  %vm54_vm1 = vcmask 130048  }
   0x4   :  { %265 = vset.pattern.permute.xlu0 %v297_v2  ;;  %248 = vmatprep.subr.bf16.mxu1 %v298_v3  ;;  %v269_v4 = vld [vmem:[%s365_s2] sm:$0xff]   ;;  %v28_v5 = vadd.s32 8, %v27_v1 }
   0x5   :  { %32 = vperm.xlu0 %265, %v27_v1   ;;  %250 = vmatprep.mubr.msk.bf16.mxu1 %vm299_vm0, %v298_v3  ;;  %v43_v6 = vld [vmem:[%s363_s0] sm:$0xf] }
   0x6   :  { %249 = vmatpush3.bf16.msra.mxu1 %v269_v4  ;;  %242 = vmatprep.subr.bf16.mxu0 %v298_v3  ;;  %v270_v7 = vld [vmem:[%s366_s3] sm:$0xff]  }
   0x7   :  { %13 = vsyncpa [#allocation4], 0  ;;  %244 = vmatprep.mubr.msk.bf16.mxu0 %vm299_vm0, %v298_v3  ;;  %267 = vset.pattern.permute.xlu1 %v297_v2  ;;  %v300_v8 = vmov 1   ;;  %v29_v9 = vlaneseq  ;;  %v148_v27 = vld [vmem:[%s367_s4] sm:$0x1]  ;;  %s301_s3 = smov [#allocation3]  }
   0x8   :  { %243 = vmatpush3.bf16.msra.mxu0 %v270_v7  ;;  %s223_s4 = sshll.u32 %s301_s3, 4  ;;  %vm215_vm6 = vcmask 57344   ;;  %s224_s4 = int_to_ptr.vmem [resolvable:$true] %s223_s4 }
   0x9   :  { %266 = vset.pattern.permute.xlu0 %v300_v8  ;;  %251 = vmatmul.mubr.msk.bf16.vlgmr.msra.gmra.mxu1 %vm54_vm1, %v43_v6  ;;  %v30_v11 = vand.u32 127, %v29_v9  ;;  %v150_v19 = vld [vmem:[#allocation2] sm:$0x1]  ;;  %v157_v28 = vshrl.u32 %v29_v9, 7  ;;  %s275_s29 = scalar_lea.vmem %s224_s4, 16  ;;  %s279_s30 = scalar_lea.vmem %s224_s4, 32 }
   0xa   :  { %36 = vperm.xlu0 %266, %v28_v5   ;;  %254 = vmatprep.subr.bf16.mxu0 %v298_v3  ;;  %p276_p0 = scmp.ne.s32.totalorder %s224_s4, %s275_s29  ;;  %p280_p1 = scmp.lt.s32.totalorder %s224_s4, %s224_s4 }
   0xb   :  { %153 = vperm.xlu1 %267, %v150_v19   ;;  %v158_v29 = vsub.s32 0, %v157_v28  ;;  %p281_p2 = scmp.lt.s32.totalorder %s279_s30, %s275_s29 }
   0xd   :  { %p282_p3 = por %p281_p2, %p280_p1 }
   0xe   :  { %268 = vset.pattern.permute.xlu0 %v297_v2 }
   0xf   :  { %p283_p4 = pnand %p282_p3, %p276_p0 }
  0x80   :  { %v33_v10 = vpop.permute.xlu0 %32 }
  0x81   :  { %vm34_vm2 = vcmp.eq.s32.totalorder %v30_v11, %v33_v10 }
  0x85   :  { %v37_v12 = vpop.permute.xlu0 %36 }
  0x86   :  { %vm38_vm3 = vcmp.eq.s32.totalorder %v30_v11, %v37_v12  ;;  %v154_v30 = vpop.permute.xlu1 %153 }
  0x87   :  { %vm39_vm4 = vmor %vm34_vm2, %vm38_vm3  ;;  %v159_v31 = vrot.slane %v154_v30, %v158_v29 }
  0x88   :  { %v231_v13 = vsel %vm39_vm4, 1.0, %v298_v3 }
  0x89   :  { %v42_v14 = vpack.c.bf16 %v231_v13, %v231_v13 }
  0x8b   :  { %245 = vmatmul.mubr.msk.bf16.vlgmr.msra.gmra.mxu0 %vm54_vm1, %v42_v14 }
  0x8c   :  { %256 = vmatprep.mubr.msk.bf16.mxu0 %vm299_vm0, %v298_v3 }
  0xc9   :  { %v141_v15 = vpop.f32.mrf.mxu1 }
  0xcb   :  { %v252_v16 = vpop.f32.mrf.mxu1 }
  0xcd   :  { %v144_v17 = vpop.f32.mrf.mxu1 }
  0xcf   :  { %v253_v18 = vpop.f32.mrf.mxu1 }
 0x14b   :  { %v92_v20 = vpop.f32.mrf.mxu0 }
 0x14c   :  { %v142_v21 = vadd.f32 %v141_v15, %v92_v20 }
 0x14d   :  { %v246_v22 = vpop.f32.mrf.mxu0 }
 0x14e   :  { %v147_v23 = vmax.f32 %v142_v21, 0.0 }
 0x14f   :  { %v95_v24 = vpop.f32.mrf.mxu0 }
 0x150   :  { %v149_v25 = vpack.c.bf16 %v147_v23, %v147_v23 }
 0x151   :  { %v247_v26 = vpop.f32.mrf.mxu0 }
 0x152   :  { %255 = vmatpush3.bf16.xpose.msra.mxu0 %v149_v25 }
 0x159   :  { %257 = vmatmul.mubr.bf16.vlgmr.msra.gmra.mxu0 %v148_v27 }
 0x219   :  { %v194_v32 = vpop.f32.mrf.mxu0 }
 0x21a   :  { %v195_v33 = vadd.f32 %v194_v32, %v159_v31 }
 0x21b   :  { %v258_v34 = vpop.f32.mrf.mxu0 }
 0x21c   :  { %v201_v35 = vand.u32 2147483647, %v195_v33  ;;  %v200_v48 = vmax.f32 %v195_v33, 0.0 }
 0x21d   :  { %v197_v36 = vpop.f32.mrf.mxu0 }
 0x21e   :  { %v202_v37 = vsub.f32 0.0, %v201_v35 }
 0x21f   :  { %v259_v38 = vpop.f32.mrf.mxu0 }
 0x220   :  { %v203_v39 = vmul.f32 1.442695, %v202_v37 }
 0x222   :  { %271 = vpow2.f32 %v203_v39 }
 0x22f   :  { %v272_v40 = vpop.eup %271 }
 0x230   :  { %v205_v41 = vadd.f32 1.0, %v272_v40  ;;  %v208_v42 = vmul.f32 -0.5, %v272_v40  ;;  %v211_v44 = vand.u32 2147483647, %v272_v40 }
 0x232   :  { %273 = vlog2.f32 %v205_v41  ;;  %v209_v43 = vadd.f32 1.0, %v208_v42  ;;  %vm212_vm5 = vcmp.lt.f32.partialorder %v211_v44, 0.0004427343 }
 0x234   :  { %v210_v47 = vmul.f32 %v272_v40, %v209_v43 }
 0x23f   :  { %v274_v45 = vpop.eup %273 }
 0x240   :  { %v207_v46 = vmul.f32 0.6931472, %v274_v45 }
 0x242   :  { %v213_v49 = vsel %vm212_vm5, %v210_v47, %v207_v46 }
 0x243   :  { %v214_v50 = vadd.f32 %v213_v49, %v200_v48 }
 0x245   :  { %216 = vst.msk [vmem:[#allocation3] sm:$0x1] %vm215_vm6, %v214_v50 }
 0x246   :  { %286 = shalt.err (!%p283_p4)
}
 0x247   :  { %226 = dma.vmem_to_hbm [thread:$0]  %s224_s4, 16, %s369_s6, [#allocation4]  }
 0x248   :  { %295 = dma.done.wait [#allocation4], 16  }
 0x249   :  { %296 = vsyncadd [#allocation4], 4294967280 }
 0x24a   :  { %230 = vsyncpa [#allocation4], 1 }

</bundles_post_ra>
